<compile_context>
chip_gen: v5e
topology: v5e:2x2
jax: 0.10.0
libtpu: 0.0.40
codegen_flags: <defaults>
</compile_context>

<pallas_src>
import jax
import jax.numpy as jnp
from jax.experimental import pallas as pl
from jax.experimental.pallas import tpu as pltpu

_LANE = 128        # lane width (last-dim granularity)
_ROW_GRAN = 16     # row granularity (bf16 packs 2 rows per sublane)
_MIB = 1 << 20


def _round_up(n, m):
    return ((n + m - 1) // m) * m


def _pad_axis(a, target, axis):
    pad = target - a.shape[axis]
    if pad == 0:
        return a
    widths = [(0, 0)] * a.ndim
    widths[axis] = (0, pad)
    return jnp.pad(a, widths)


# ---------------------------------------------------------------------------
# Parameter preparation -- run ONCE at policy init, NOT per forward call.
# ---------------------------------------------------------------------------
def prepare_policy_params(w1, b1, w2, b2):
    """Pad feature dims to 128 lanes and cast weights to bf16 (one time).

    Zero padding is exact for this MLP: zero input columns / weight rows /
    bias lanes contribute nothing to the un-padded outputs.
    """
    b1 = jnp.reshape(b1, (1, -1))
    b2 = jnp.reshape(b2, (1, -1))
    S, P1 = w1.shape
    P1b, P2 = w2.shape
    assert P1b == P1, (w1.shape, w2.shape)
    assert b1.shape[1] == P1 and b2.shape[1] == P2, (b1.shape, b2.shape)

    S_p = _round_up(S, _LANE)
    P1_p = _round_up(P1, _LANE)
    P2_p = _round_up(P2, _LANE)

    w1_p = _pad_axis(_pad_axis(w1, S_p, 0), P1_p, 1).astype(jnp.bfloat16)
    w2_p = _pad_axis(_pad_axis(w2, P1_p, 0), P2_p, 1).astype(jnp.bfloat16)
    # Biases stay f32 (bias add + ReLU run in f32 on the VPU).
    b1_p = _pad_axis(b1, P1_p, 1).astype(jnp.float32)
    b2_p = _pad_axis(b2, P2_p, 1).astype(jnp.float32)
    dims = dict(S=S, P1=P1, P2=P2, S_p=S_p, P1_p=P1_p, P2_p=P2_p)
    return dict(w1=w1_p, b1=b1_p, w2=w2_p, b2=b2_p, dims=dims)


# ---------------------------------------------------------------------------
# Kernel
# ---------------------------------------------------------------------------
def _policy_head_kernel(x_ref, w1_ref, b1_ref, w2_ref, b2_ref, out_ref):
    """Fused out = ReLU(x @ W1 + b1) @ W2 + b2 for one batch tile."""
    # x block arrives f32; cast to bf16 on the VPU right before the MXU dot
    # (no wrapper-side cast / HBM round trip of the activations).
    x = x_ref[...].astype(jnp.bfloat16)
    h = jnp.dot(x, w1_ref[...], preferred_element_type=jnp.float32)
    # Bias add + policy_non_linearity (ReLU) in f32 on the VPU.
    h = jnp.maximum(h + b1_ref[...], 0.0)
    o = jnp.dot(h.astype(w2_ref.dtype), w2_ref[...],
                preferred_element_type=jnp.float32)
    out_ref[...] = (o + b2_ref[...]).astype(out_ref.dtype)


# ---------------------------------------------------------------------------
# Tile selection: VMEM-budget driven, generation-safe (fits v7x's 64 MiB).
# ---------------------------------------------------------------------------
def _pick_tile_b(B, S_p, P1_p, P2_p):
    B_r = _round_up(B, _ROW_GRAN)
    # Pinned parameter footprint (bf16 weights + f32 biases).
    weight_bytes = (S_p * P1_p + P1_p * P2_p) * 2 + (P1_p + P2_p) * 4
    # Conservative activation budget: stays inside v7x's 64 MiB physical VMEM
    # (and far below v5e/v6e's 128 MiB) with headroom for compiler scratch.
    budget = 40 * _MIB - 2 * weight_bytes
    # Per-row VMEM: double-buffered f32 x block + double-buffered out block
    # + f32 hidden intermediate + f32 output temp.
    per_row = 2 * S_p * 4 + 2 * P2_p * 4 + P1_p * 4 + P2_p * 4
    if budget > per_row * _ROW_GRAN:
        cap = (budget // per_row) // _ROW_GRAN * _ROW_GRAN
    else:
        cap = _ROW_GRAN
    tile = min(512, cap, B_r)
    # Small batch: split into >=2 tiles so both v7x TensorCores get work.
    if B_r <= tile and B_r >= 2 * _ROW_GRAN:
        tile = _round_up((B_r + 1) // 2, _ROW_GRAN)
    return int(max(_ROW_GRAN, _round_up(tile, _ROW_GRAN)))


# ---------------------------------------------------------------------------
# Forward wrapper
# ---------------------------------------------------------------------------
def policy_head(x, params, *, tile_b=None, out_dtype=jnp.float32):
    """Fused 2-layer policy-head MLP with pre-padded bf16 parameters."""
    d = params["dims"]
    S, P2 = d["S"], d["P2"]
    S_p, P1_p, P2_p = d["S_p"], d["P1_p"], d["P2_p"]
    B = x.shape[0]
    assert x.shape[1] == S, (x.shape, S)

    if tile_b is None:
        tile_b = _pick_tile_b(B, S_p, P1_p, P2_p)
    tile_b = max(_ROW_GRAN,
                 _round_up(min(tile_b, _round_up(B, _ROW_GRAN)), _ROW_GRAN))
    B_p = _round_up(B, tile_b)
    grid_b = B_p // tile_b

    # x stays f32; pads are no-ops when shapes are already aligned.
    x_p = _pad_axis(_pad_axis(x, B_p, 0), S_p, 1).astype(jnp.float32)

    # Explicit scoped-VMEM limit (defaults: 16 MiB v5e / 32 MiB v6e+);
    # cap at 64 MiB so it never exceeds v7x physical VMEM.
    weight_bytes = (S_p * P1_p + P1_p * P2_p) * 2 + (P1_p + P2_p) * 4
    act_bytes = tile_b * (2 * S_p * 4 + 2 * P2_p * 4 + P1_p * 4 + P2_p * 4)
    vmem_limit = int(min(64 * _MIB,
                         max(2 * (2 * weight_bytes + act_bytes), 32 * _MIB)))

    def build(single_buffer_weights):
        if single_buffer_weights:
            # Constant index_map -> single buffer is enough; halves the
            # resident-parameter VMEM footprint.
            def w_spec(shape):
                return pl.BlockSpec(shape, lambda i: (0, 0),
                                    pipeline_mode=pl.Buffered(1))
        else:
            def w_spec(shape):
                return pl.BlockSpec(shape, lambda i: (0, 0))
        return pl.pallas_call(
            _policy_head_kernel,
            out_shape=jax.ShapeDtypeStruct((B_p, P2_p), out_dtype),
            grid=(grid_b,),
            in_specs=[
                # Batch-tiled activations: block advances with the grid.
                pl.BlockSpec((tile_b, S_p), lambda i: (i, 0)),
                # Weights / biases: same block every step -> VMEM-resident.
                w_spec((S_p, P1_p)),
                w_spec((1, P1_p)),
                w_spec((P1_p, P2_p)),
                w_spec((1, P2_p)),
            ],
            out_specs=pl.BlockSpec((tile_b, P2_p), lambda i: (i, 0)),
            compiler_params=pltpu.CompilerParams(
                dimension_semantics=(("parallel",) if grid_b > 1
                                     else ("arbitrary",)),
                vmem_limit_bytes=vmem_limit,
            ),
        )

    args = (x_p, params["w1"], params["b1"], params["w2"], params["b2"])
    try:
        out_p = build(True)(*args)
    except Exception:
        # Fallback if this jax build rejects single-buffered BlockSpecs.
        out_p = build(False)(*args)

    # Strip batch / lane padding.
    return out_p[:B, :P2]


# ---------------------------------------------------------------------------
# References
# ---------------------------------------------------------------------------
def _reference_bf16(x, w1, b1, w2, b2):
    # Same bf16-operand / f32-accumulate recipe as the kernel.
    h = jnp.dot(x.astype(jnp.bfloat16), w1.astype(jnp.bfloat16),
                preferred_element_type=jnp.float32)
    h = jnp.maximum(h + jnp.reshape(b1, (1, -1)), 0.0)
    o = jnp.dot(h.astype(jnp.bfloat16), w2.astype(jnp.bfloat16),
                preferred_element_type=jnp.float32)
    return o + jnp.reshape(b2, (1, -1))


def _reference_f32(x, w1, b1, w2, b2):
    h = jnp.maximum(x @ w1 + jnp.reshape(b1, (1, -1)), 0.0)
    return h @ w2 + jnp.reshape(b2, (1, -1))


if __name__ == "__main__":
    # Small shapes implied by the module's __init__ (state_dim ->
    # policy_dim1 -> policy_dim2), lane-aligned; batch chosen small.
    batch = 32
    state_dim = 128
    policy_dim1 = 128
    policy_dim2 = 128

    key = jax.random.PRNGKey(0)
    k_x, k_w1, k_b1, k_w2, k_b2 = jax.random.split(key, 5)

    x = jax.random.normal(k_x, (batch, state_dim), dtype=jnp.float32)
    # Deterministic parameter init (synthetic; not a checkpoint load).
    w1 = jax.random.normal(k_w1, (state_dim, policy_dim1), jnp.float32) * 0.1
    b1 = jax.random.normal(k_b1, (1, policy_dim1), jnp.float32) * 0.01
    w2 = jax.random.normal(k_w2, (policy_dim1, policy_dim2), jnp.float32) * 0.1
    b2 = jax.random.normal(k_b2, (policy_dim2,), jnp.float32) * 0.01  # (P,)-shaped

    # One-time parameter prep (pad + bf16 cast), then the hot forward path.
    params = prepare_policy_params(w1, b1, w2, b2)
    out = policy_head(x, params)
    out = jax.block_until_ready(out)

    ref16 = _reference_bf16(x, w1, b1, w2, b2)
    ref32 = _reference_f32(x, w1, b1, w2, b2)
    assert out.shape == (batch, policy_dim2), out.shape
    assert jnp.allclose(out, ref16, atol=5e-3, rtol=5e-3), "mismatch vs bf16 reference"
    assert jnp.allclose(out, ref32, atol=5e-2, rtol=5e-2), "mismatch vs f32 reference"

    print("KERNEL_OK")
</pallas_src>

<mosaic_0001>
module attributes {stable_mosaic.version = 11 : i64} {
  func.func @_policy_head_kernel(%arg0: i32, %arg1: memref<16x128xf32, #tpu.memory_space<vmem>>, %arg2: memref<128x128xbf16, #tpu.memory_space<vmem>>, %arg3: memref<1x128xf32, #tpu.memory_space<vmem>>, %arg4: memref<128x128xbf16, #tpu.memory_space<vmem>>, %arg5: memref<1x128xf32, #tpu.memory_space<vmem>>, %arg6: memref<16x128xf32, #tpu.memory_space<vmem>>) attributes {dimension_semantics = [#tpu.dimension_semantics<parallel>], iteration_bounds = array<i64: 2>, scalar_prefetch = 0 : i64, scratch_operands = 0 : i64, tpu.core_type = #tpu.core_type<tc>, window_params = [{transform_indices = @transform_0, window_bounds = array<i64: 16, 128>}, {pipeline_mode = #tpu.pipeline_mode<synchronous>, transform_indices = @transform_1, window_bounds = array<i64: 128, 128>}, {pipeline_mode = #tpu.pipeline_mode<synchronous>, transform_indices = @transform_2, window_bounds = array<i64: 1, 128>}, {pipeline_mode = #tpu.pipeline_mode<synchronous>, transform_indices = @transform_3, window_bounds = array<i64: 128, 128>}, {pipeline_mode = #tpu.pipeline_mode<synchronous>, transform_indices = @transform_4, window_bounds = array<i64: 1, 128>}, {transform_indices = @transform_5, window_bounds = array<i64: 16, 128>}]} {
    %c0 = arith.constant 0 : index
    %c0_0 = arith.constant 0 : index
    %0 = vector.load %arg1[%c0, %c0_0] : memref<16x128xf32, #tpu.memory_space<vmem>>, vector<16x128xf32>
    %1 = arith.truncf %0 : vector<16x128xf32> to vector<16x128xbf16>
    %c0_1 = arith.constant 0 : index
    %c0_2 = arith.constant 0 : index
    %2 = vector.load %arg2[%c0_1, %c0_2] : memref<128x128xbf16, #tpu.memory_space<vmem>>, vector<128x128xbf16>
    %cst = arith.constant dense<0.000000e+00> : vector<16x128xf32>
    %3 = tpu.matmul %1, %2, %cst {dimension_numbers = #tpu.dot_dimension_numbers<[1], [0], [0], [1], [0, 0, 1, 1], [], []>} : vector<16x128xbf16>, vector<128x128xbf16>, vector<16x128xf32> -> vector<16x128xf32>
    %c0_3 = arith.constant 0 : index
    %c0_4 = arith.constant 0 : index
    %4 = vector.load %arg3[%c0_3, %c0_4] : memref<1x128xf32, #tpu.memory_space<vmem>>, vector<1x128xf32>
    %5 = vector.broadcast %4 : vector<1x128xf32> to vector<16x128xf32>
    %6 = arith.addf %3, %5 : vector<16x128xf32>
    %cst_5 = arith.constant 0.000000e+00 : f32
    %7 = vector.broadcast %cst_5 : f32 to vector<16x128xf32>
    %8 = arith.maximumf %6, %7 : vector<16x128xf32>
    %9 = arith.truncf %8 : vector<16x128xf32> to vector<16x128xbf16>
    %c0_6 = arith.constant 0 : index
    %c0_7 = arith.constant 0 : index
    %10 = vector.load %arg4[%c0_6, %c0_7] : memref<128x128xbf16, #tpu.memory_space<vmem>>, vector<128x128xbf16>
    %cst_8 = arith.constant dense<0.000000e+00> : vector<16x128xf32>
    %11 = tpu.matmul %9, %10, %cst_8 {dimension_numbers = #tpu.dot_dimension_numbers<[1], [0], [0], [1], [0, 0, 1, 1], [], []>} : vector<16x128xbf16>, vector<128x128xbf16>, vector<16x128xf32> -> vector<16x128xf32>
    %c0_9 = arith.constant 0 : index
    %c0_10 = arith.constant 0 : index
    %12 = vector.load %arg5[%c0_9, %c0_10] : memref<1x128xf32, #tpu.memory_space<vmem>>, vector<1x128xf32>
    %13 = vector.broadcast %12 : vector<1x128xf32> to vector<16x128xf32>
    %14 = arith.addf %11, %13 : vector<16x128xf32>
    %c0_11 = arith.constant 0 : index
    %c0_12 = arith.constant 0 : index
    %15 = vector.load %arg6[%c0_11, %c0_12] : memref<16x128xf32, #tpu.memory_space<vmem>>, vector<16x128xf32>
    tpu.vector_store %arg6[%c0_11, %c0_12], %14 {strides = array<i32>} : memref<16x128xf32, #tpu.memory_space<vmem>>, vector<16x128xf32>,
    return
  }
  func.func @transform_0(%arg0: i32) -> (i32, i32) {
    %c0_i32 = arith.constant 0 : i32
    %c0_i32_0 = arith.constant 0 : i32
    return %arg0, %c0_i32 : i32, i32
  }
  func.func @transform_1(%arg0: i32) -> (i32, i32) {
    %c0_i32 = arith.constant 0 : i32
    %c0_i32_0 = arith.constant 0 : i32
    %c0_i32_1 = arith.constant 0 : i32
    return %c0_i32, %c0_i32_0 : i32, i32
  }
  func.func @transform_2(%arg0: i32) -> (i32, i32) {
    %c0_i32 = arith.constant 0 : i32
    %c0_i32_0 = arith.constant 0 : i32
    %c0_i32_1 = arith.constant 0 : i32
    return %c0_i32, %c0_i32_0 : i32, i32
  }
  func.func @transform_3(%arg0: i32) -> (i32, i32) {
    %c0_i32 = arith.constant 0 : i32
    %c0_i32_0 = arith.constant 0 : i32
    %c0_i32_1 = arith.constant 0 : i32
    return %c0_i32, %c0_i32_0 : i32, i32
  }
  func.func @transform_4(%arg0: i32) -> (i32, i32) {
    %c0_i32 = arith.constant 0 : i32
    %c0_i32_0 = arith.constant 0 : i32
    %c0_i32_1 = arith.constant 0 : i32
    return %c0_i32, %c0_i32_0 : i32, i32
  }
  func.func @transform_5(%arg0: i32) -> (i32, i32) {
    %c0_i32 = arith.constant 0 : i32
    %c0_i32_0 = arith.constant 0 : i32
    return %arg0, %c0_i32 : i32, i32
  }
}

module attributes {stable_mosaic.version = 11 : i64} {
  func.func @_policy_head_kernel(%arg0: i32, %arg1: memref<16x128xf32, #tpu.memory_space<vmem>>, %arg2: memref<128x128xbf16, #tpu.memory_space<vmem>>, %arg3: memref<1x128xf32, #tpu.memory_space<vmem>>, %arg4: memref<128x128xbf16, #tpu.memory_space<vmem>>, %arg5: memref<1x128xf32, #tpu.memory_space<vmem>>, %arg6: memref<16x128xf32, #tpu.memory_space<vmem>>) attributes {dimension_semantics = [#tpu.dimension_semantics<parallel>], iteration_bounds = array<i64: 2>, scalar_prefetch = 0 : i64, scratch_operands = 0 : i64, tpu.core_type = #tpu.core_type<tc>, window_params = [{transform_indices = @transform_0, window_bounds = array<i64: 16, 128>}, {pipeline_mode = #tpu.pipeline_mode<synchronous>, transform_indices = @transform_1, window_bounds = array<i64: 128, 128>}, {pipeline_mode = #tpu.pipeline_mode<synchronous>, transform_indices = @transform_2, window_bounds = array<i64: 1, 128>}, {pipeline_mode = #tpu.pipeline_mode<synchronous>, transform_indices = @transform_3, window_bounds = array<i64: 128, 128>}, {pipeline_mode = #tpu.pipeline_mode<synchronous>, transform_indices = @transform_4, window_bounds = array<i64: 1, 128>}, {transform_indices = @transform_5, window_bounds = array<i64: 16, 128>}]} {
    %c0 = arith.constant 0 : index
    %c0_0 = arith.constant 0 : index
    %0 = vector.load %arg1[%c0, %c0_0] : memref<16x128xf32, #tpu.memory_space<vmem>>, vector<16x128xf32>
    %1 = arith.truncf %0 : vector<16x128xf32> to vector<16x128xbf16>
    %c0_1 = arith.constant 0 : index
    %c0_2 = arith.constant 0 : index
    %2 = vector.load %arg2[%c0_1, %c0_2] : memref<128x128xbf16, #tpu.memory_space<vmem>>, vector<128x128xbf16>
    %cst = arith.constant dense<0.000000e+00> : vector<16x128xf32>
    %3 = tpu.matmul %1, %2, %cst {dimension_numbers = #tpu.dot_dimension_numbers<[1], [0], [0], [1], [0, 0, 1, 1], [], []>} : vector<16x128xbf16>, vector<128x128xbf16>, vector<16x128xf32> -> vector<16x128xf32>
    %c0_3 = arith.constant 0 : index
    %c0_4 = arith.constant 0 : index
    %4 = vector.load %arg3[%c0_3, %c0_4] : memref<1x128xf32, #tpu.memory_space<vmem>>, vector<1x128xf32>
    %5 = vector.broadcast %4 : vector<1x128xf32> to vector<16x128xf32>
    %6 = arith.addf %3, %5 : vector<16x128xf32>
    %cst_5 = arith.constant 0.000000e+00 : f32
    %7 = vector.broadcast %cst_5 : f32 to vector<16x128xf32>
    %8 = arith.maximumf %6, %7 : vector<16x128xf32>
    %9 = arith.truncf %8 : vector<16x128xf32> to vector<16x128xbf16>
    %c0_6 = arith.constant 0 : index
    %c0_7 = arith.constant 0 : index
    %10 = vector.load %arg4[%c0_6, %c0_7] : memref<128x128xbf16, #tpu.memory_space<vmem>>, vector<128x128xbf16>
    %cst_8 = arith.constant dense<0.000000e+00> : vector<16x128xf32>
    %11 = tpu.matmul %9, %10, %cst_8 {dimension_numbers = #tpu.dot_dimension_numbers<[1], [0], [0], [1], [0, 0, 1, 1], [], []>} : vector<16x128xbf16>, vector<128x128xbf16>, vector<16x128xf32> -> vector<16x128xf32>
    %c0_9 = arith.constant 0 : index
    %c0_10 = arith.constant 0 : index
    %12 = vector.load %arg5[%c0_9, %c0_10] : memref<1x128xf32, #tpu.memory_space<vmem>>, vector<1x128xf32>
    %13 = vector.broadcast %12 : vector<1x128xf32> to vector<16x128xf32>
    %14 = arith.addf %11, %13 : vector<16x128xf32>
    %c0_11 = arith.constant 0 : index
    %c0_12 = arith.constant 0 : index
    %15 = vector.load %arg6[%c0_11, %c0_12] : memref<16x128xf32, #tpu.memory_space<vmem>>, vector<16x128xf32>
    tpu.vector_store %arg6[%c0_11, %c0_12], %14 {strides = array<i32>} : memref<16x128xf32, #tpu.memory_space<vmem>>, vector<16x128xf32>,
    return
  }
  func.func @transform_0(%arg0: i32) -> (i32, i32) {
    %c0_i32 = arith.constant 0 : i32
    %c0_i32_0 = arith.constant 0 : i32
    return %arg0, %c0_i32 : i32, i32
  }
  func.func @transform_1(%arg0: i32) -> (i32, i32) {
    %c0_i32 = arith.constant 0 : i32
    %c0_i32_0 = arith.constant 0 : i32
    %c0_i32_1 = arith.constant 0 : i32
    return %c0_i32, %c0_i32_0 : i32, i32
  }
  func.func @transform_2(%arg0: i32) -> (i32, i32) {
    %c0_i32 = arith.constant 0 : i32
    %c0_i32_0 = arith.constant 0 : i32
    %c0_i32_1 = arith.constant 0 : i32
    return %c0_i32, %c0_i32_0 : i32, i32
  }
  func.func @transform_3(%arg0: i32) -> (i32, i32) {
    %c0_i32 = arith.constant 0 : i32
    %c0_i32_0 = arith.constant 0 : i32
    %c0_i32_1 = arith.constant 0 : i32
    return %c0_i32, %c0_i32_0 : i32, i32
  }
  func.func @transform_4(%arg0: i32) -> (i32, i32) {
    %c0_i32 = arith.constant 0 : i32
    %c0_i32_0 = arith.constant 0 : i32
    %c0_i32_1 = arith.constant 0 : i32
    return %c0_i32, %c0_i32_0 : i32, i32
  }
  func.func @transform_5(%arg0: i32) -> (i32, i32) {
    %c0_i32 = arith.constant 0 : i32
    %c0_i32_0 = arith.constant 0 : i32
    return %arg0, %c0_i32 : i32, i32
  }
}

</mosaic_0001>

<bundles_post_ra>
// kernel: tpu_custom_call.1
= control target key start
LH: loop header
LB: loop body
LE: loop exit
PB: predicated region body
PF: predicated region fallthrough
CT: control target
= control target key end

     0   :  { %10 = vsyncpa [#allocation3], 0  ;;  %s1086_s0 = inlined_call_operand.hbm [shape: f32[32,128], index: 0, kind: input, shape index: {}]   ;;  %s1087_s1 = inlined_call_operand.hbm [shape: bf16[128,128], index: 1, kind: input, shape index: {}]   ;;  %s1088_s2 = inlined_call_operand.vmem [shape: f32[1,128], index: 2, kind: input, shape index: {}]   ;;  %s1089_s3 = inlined_call_operand.hbm [shape: bf16[128,128], index: 3, kind: input, shape index: {}]   ;;  %s1090_s4 = inlined_call_operand.vmem [shape: f32[1,128], index: 4, kind: input, shape index: {}]   ;;  %s1091_s5 = inlined_call_operand.hbm [shape: f32[32,128], index: 5, kind: output, shape index: {}]  }
   0x1   :  { %12 = vsyncpa [#allocation3 + $0x1], 0 }
   0x2   :  { %13 = vsyncpa [#allocation6], 0 }
   0x3   :  { %14 = vsyncpa [#allocation4], 0 }
   0x4   :  { %16 = vsyncpa [#allocation4 + $0x1], 0  ;;  %s935_s18 = smov 0   ;;  %s937_s19 = smov 0  }
   0x5   :  { %s939_s20 = smov 0   ;;  %s941_s21 = smov 0  }
   0x6 LB: > { %s956_s22 = sadd.s32 4294967295, %s895_s21   ;;  %s560_s23 = sadd.s32 4294967294, %s895_s21   ;;  %s895_s21 = sphi %s941_s21, %s1101_s21   ;;  %s891_s20 = sphi %s939_s20, %s1100_s20   ;;  %s887_s19 = sphi %s937_s19, %s1099_s19   ;;  %s883_s18 = sphi %s935_s18, %s1098_s18  }
   0x7   : > { %p42_p0 = scmp.ne.s32.totalorder %s887_s19, %s883_s18  ;;  %p43_p1 = scmp.eq.s32.totalorder %s956_s22, 0 }
   0x8   : > { %p150_p2 = scmp.eq.s32.totalorder %s956_s22, 1  ;;  %p156_p3 = scmp.eq.s32.totalorder %s560_s23, 1 }
   0x9   : > { %p965_p4 = por %p43_p1, %p42_p0  ;;  %p561_p5 = scmp.ge.s32.totalorder %s895_s21, 1 }
   0xa   : > { %p970_p6 = por %p156_p3, %p42_p0  ;;  %p163_p7 = scmp.lt.s32.totalorder %s895_s21, 3 }
   0xb   : > { %s174_s28 = sshll.u32 %s1087_s1, 4  ;;  %s897_s30 = smov [#allocation5]   ;;  %s175_s28 = int_to_ptr.hbm [resolvable:$true] %s174_s28 }
   0xc   : > { %p978_p8 = pnand %p561_p5, %p163_p7  ;;  %s176_s6 = sshll.u32 %s897_s30, 4  ;;  %s177_s6 = int_to_ptr.vmem [resolvable:$true] %s176_s6 }
   0xd   : > { %s191_s9 = sshll.u32 %s1089_s3, 4  ;;  %s898_s10 = smov 64   ;;  %s192_s9 = int_to_ptr.hbm [resolvable:$true] %s191_s9 }
   0xe   : > { %p672_p9 = pneg %p978_p8  ;;  %s899_s11 = smov 4  }
   0xf   : > { %s900_s12 = smov [#allocation7]   ;;  %s991_s14 = sadd.s32 1, %s895_s21  }
  0x10   : > { %p673_p10 = pnand %p672_p9, %p43_p1  ;;  %s193_s13 = sshll.u32 %s900_s12, 4  ;;  %s194_s13 = int_to_ptr.vmem [resolvable:$true] %s193_s13 }
  0x11   : > { %s29_s15 = sadd.s32 1, %s891_s20  ;;  %s26_s16 = ssub.s32 %s895_s21, %s991_s14 }
  0x12   : > { %675 = dma.hbm_to_vmem [thread:$0]  (!%p673_p10), %s175_s28, 1024, %s177_s6, [#allocation6], %s898_s10, %s898_s10, %s899_s11  }
  0x13   : > { %678 = dma.hbm_to_vmem [thread:$0]  (!%p673_p10), %s192_s9, 1024, %s194_s13, [#allocation6], %s898_s10, %s898_s10, %s899_s11  }
  0x14   : > { %p36_p12 = scmp.ne.s32.totalorder %s891_s20, %s887_s19  ;;  %p27_p13 = scmp.eq.s32.totalorder %s26_s16, 0 }
  0x15   : > { %p37_p0 = scmp.eq.s32.totalorder %s895_s21, 0  ;;  %p689_p5 = scmp.lt.s32.totalorder %s895_s21, 2 }
  0x16   : > { %p1001_p3 = por %p150_p2, %p36_p12  ;;  %s210_s26 = sand.u32 1, %s891_s20  }
  0x17   : > { %s1007_s23 = scalar_select %p27_p13, %s891_s20, %s29_s15  }
  0x18   : > { %p38_p7 = por %p37_p0, %p36_p12  ;;  %s565_s27 = sshll.u32 %s210_s26, 4 }
  0x19   : > { %s642_s28 = sshll.u32 %s895_s21, 4  ;;  %s214_s8 = scalar_lea.vmem [#allocation2], %s565_s27 }
  0x1a   : > { %s219_s7 = scalar_lea.hbm %s1086_s0, %s642_s28  ;;  %s222_s9 = sshll.u32 %s214_s8, 4  ;;  %s223_s9 = int_to_ptr.vmem [resolvable:$true] %s222_s9 }
  0x1b   : > { %s220_s10 = sshll.u32 %s219_s7, 4  ;;  %p1014_p2 = pnand %p689_p5, %p38_p7  ;;  %s221_s10 = int_to_ptr.hbm [resolvable:$true] %s220_s10 }
  0x1c   : > { %s211_s12 = scalar_lea.sflag [#allocation3], %s210_s26  ;;  %s795_s13 = sshra.s32 %s221_s10, 4  ;;  %s796_s13 = int_to_ptr.hbm [resolvable:$true] %s795_s13 }
  0x1d   : > { %s797_s15 = scalar_lea.hbm %s796_s13, 16  ;;  %p799_p10 = pneg %p1014_p2 }
  0x1e   : > { %p798_p9 = scmp.ne.s32.totalorder %s796_s13, %s797_s15  ;;  %s802_s28 = scalar_lea.hbm %s1086_s0, 32 }
  0x1f   : > { %p803_p0 = scmp.lt.s32.totalorder %s796_s13, %s1086_s0  ;;  %p804_p5 = scmp.lt.s32.totalorder %s802_s28, %s797_s15 }
  0x20   : > { %p800_p12 = pnand %p799_p10, %p798_p9 }
  0x21   : > { %p805_p7 = por %p804_p5, %p803_p0 }
  0x22   : > { %p801_p13 = pneg %p800_p12 }
  0x24   : > { %p806_p11 = pnand %p805_p7, %p801_p13 }
  0x26   : > { %809 = shalt.err (!%p806_p11)
}
  0x27   : > { %s901_s26 = smov 128   ;;  %s902_s7 = smov 8  }
  0x28   : > { %682 = dma.hbm_to_vmem [thread:$0]  (!%p1014_p2), %s221_s10, 256, %s223_s9, %s211_s12, %s901_s26, %s901_s26, %s902_s7  }
  0x29   : > { %234 = sbr.rel (%p978_p8) target bundleno = 361 (0x169), region = 40  ;;  %s1031_s8 = sand.u32 (!%p978_p8), 1, %s887_s19  }
  0x2a   : > { %s569_s13 = sshll.u32 (!%p978_p8), %s1031_s8, 4  ;;  %s237_s15 = scalar_lea.sflag (!%p978_p8), [#allocation3], %s1031_s8 }
  0x2b   : > { %s240_s16 = scalar_lea.vmem (!%p978_p8), [#allocation2], %s569_s13 }
  0x2e   : > { %870 = dma.done.wait (%p965_p4), %s237_s15, 256  }
  0x2f   : > { %872 = vsyncadd (%p965_p4), %s237_s15, 4294967040 }
  0x30   : > { %874 = dma.done.wait (%p43_p1), [#allocation6], 2048  }
  0x31   : > { %876 = vsyncadd (%p43_p1), [#allocation6], 4294965248  ;;  %v650_v0 = vld [vmem:[#allocation5 + $0x38] sm:$0xff]  ;;  %v649_v1 = vld [vmem:[#allocation5 + $0x30] sm:$0xff]  ;;  %s659_s11 = sshll.u32 %s956_s22, 4  ;;  %s277_s30 = scalar_lea.vmem [#allocation8], %s569_s13 }
  0x32   : > { %351 = vmatpush.bf16.msra.mxu0 %v650_v0  ;;  %v658_v2 = vld [vmem:[#allocation7 + $0x38] sm:$0xff]  ;;  %v657_v3 = vld [vmem:[#allocation7 + $0x30] sm:$0xff]  ;;  %v648_v4 = vld [vmem:[#allocation5 + $0x28] sm:$0xff]  ;;  %s464_s28 = scalar_lea.hbm %s1091_s5, %s659_s11  ;;  %s465_s6 = sshll.u32 %s277_s30, 4  ;;  %s466_s6 = int_to_ptr.vmem [resolvable:$true] %s465_s6 }
  0x33   : > { %436 = vmatpush.bf16.msra.mxu1 %v658_v2  ;;  %v656_v5 = vld [vmem:[#allocation7 + $0x28] sm:$0xff]  ;;  %v647_v6 = vld [vmem:[#allocation5 + $0x20] sm:$0xff]  ;;  %v646_v8 = vld [vmem:[#allocation5 + $0x18] sm:$0xff]  ;;  %s467_s26 = sshll.u32 %s464_s28, 4  ;;  %s453_s7 = scalar_lea.sflag [#allocation4], %s1031_s8  ;;  %s468_s26 = int_to_ptr.hbm [resolvable:$true] %s467_s26 }
  0x34   : > { %v655_v7 = vld [vmem:[#allocation7 + $0x20] sm:$0xff]  ;;  %v645_v9 = vld [vmem:[#allocation5 + $0x10] sm:$0xff]  ;;  %v644_v10 = vld [vmem:[#allocation5 + $0x8] sm:$0xff]  ;;  %s839_s15 = sshra.s32 %s468_s26, 4  ;;  %s845_s13 = scalar_lea.hbm %s1091_s5, 32  ;;  %s840_s15 = int_to_ptr.hbm [resolvable:$true] %s839_s15 }
  0x35   : > { %v643_v11 = vld [vmem:[#allocation5] sm:$0xff]  ;;  %v281_v13 = vld [vmem:[%s240_s16 + $0x8] sm:$0xff]  ;;  %v653_v16 = vld [vmem:[#allocation7 + $0x10] sm:$0xff]  ;;  %s841_s22 = scalar_lea.hbm %s840_s15, 16  ;;  %p846_p11 = scmp.lt.s32.totalorder %s840_s15, %s1091_s5 }
  0x36   : > { %352 = vmatpush.bf16.msra.mxu0 %v649_v1  ;;  %v280_v12 = vld [vmem:[%s240_s16] sm:$0xff]  ;;  %v654_v15 = vld [vmem:[#allocation7 + $0x18] sm:$0xff]  ;;  %v652_v17 = vld [vmem:[#allocation7 + $0x8] sm:$0xff]  ;;  %p842_p1 = scmp.ne.s32.totalorder %s840_s15, %s841_s22  ;;  %p847_p2 = scmp.lt.s32.totalorder %s845_s13, %s841_s22 }
  0x37   : > { %437 = vmatpush.bf16.msra.mxu1 %v657_v3  ;;  %v282_v14 = vpack.c.bf16 %v281_v13, %v280_v12  ;;  %v651_v18 = vld [vmem:[#allocation7] sm:$0xff] }
  0x38   : > { %v733_v20 = vld [vmem:[%s1088_s2] ss:$0 sm:$0xff]  ;;  %p843_p4 = pnand %p842_p1, %p1001_p3  ;;  %p848_p9 = por %p847_p2, %p846_p11 }
  0x39   : > { %v734_v27 = vld [vmem:[%s1090_s4] ss:$0 sm:$0xff] }
  0x3a   : > { %353 = vmatpush.bf16.msra.mxu0 %v648_v4  ;;  %p844_p8 = pneg %p843_p4 }
  0x3b   : > { %438 = vmatpush.bf16.msra.mxu1 %v656_v5 }
  0x3c   : > { %p849_p10 = pnand %p848_p9, %p844_p8 }
  0x3e   : > { %354 = vmatpush.bf16.msra.mxu0 %v647_v6 }
  0x3f   : > { %439 = vmatpush.bf16.msra.mxu1 %v655_v7 }
  0x42   : > { %355 = vmatpush.bf16.msra.mxu0 %v646_v8 }
  0x43   : > { %440 = vmatpush.bf16.msra.mxu1 %v654_v15 }
  0x46   : > { %356 = vmatpush.bf16.msra.mxu0 %v645_v9 }
  0x47   : > { %441 = vmatpush.bf16.msra.mxu1 %v653_v16 }
  0x4a   : > { %357 = vmatpush.bf16.msra.mxu0 %v644_v10 }
  0x4b   : > { %442 = vmatpush.bf16.msra.mxu1 %v652_v17 }
  0x4e   : > { %358 = vmatpush.bf16.msra.mxu0 %v643_v11 }
  0x4f   : > { %443 = vmatpush.bf16.msra.mxu1 %v651_v18 }
  0x51   : > { %359 = vmatmul.bf16.vlgmr.msra.gmra.mxu0 %v282_v14 }
  0xce   : > { %v360_v19 = vpop.f32.mrf.mxu0 }
  0xcf   : > { %v361_v21 = vadd.f32 %v733_v20, %v360_v19 }
  0xd1   : > { %v365_v24 = vmax.f32 %v361_v21, 0.0 }
  0xd6   : > { %v362_v22 = vpop.f32.mrf.mxu0 }
  0xd7   : > { %v363_v23 = vadd.f32 %v733_v20, %v362_v22 }
  0xd9   : > { %v366_v25 = vmax.f32 %v363_v23, 0.0 }
  0xdb   : > { %v367_v26 = vpack.c.bf16 %v366_v25, %v365_v24 }
  0xdd   : > { %444 = vmatmul.bf16.vlgmr.msra.gmra.mxu1 %v367_v26 }
 0x15a   : > { %v445_v28 = vpop.f32.mrf.mxu1 }
 0x15b   : > { %v446_v29 = vadd.f32 %v734_v27, %v445_v28 }
 0x15d   : > { %450 = vst [vmem:[%s277_s30] sm:$0xff] %v446_v29 }
 0x162   : > { %v447_v30 = vpop.f32.mrf.mxu1 }
 0x163   : > { %v448_v31 = vadd.f32 %v734_v27, %v447_v30 }
 0x165   : > { %451 = vst [vmem:[%s277_s30 + $0x8] sm:$0xff] %v448_v31 }
 0x166   : > { %852 = shalt.err (!%p849_p10)
}
 0x167   : > { %s903_s8 = smov 128   ;;  %s904_s10 = smov 8  }
 0x168   : > { %670 = dma.vmem_to_hbm [thread:$0]  (%p1001_p3), %s466_s6, 256, %s468_s26, %s453_s7, %s903_s8, %s903_s8, %s904_s10  }
 0x169 PF: > { %s482_s11 = sand.u32 1, %s883_s18   ;;  %p1097_p12 = scmp.ge.s32.totalorder %s895_s21, 2 }
 0x16a   : > { %s483_s12 = scalar_lea.sflag [#allocation4], %s482_s11 }
 0x16b   : > { %p684_p13 = pnand %p1097_p12, %p970_p6 }
 0x16d   : > { %p685_p0 = pneg %p684_p13 }
 0x16f   : > { %878 = dma.done.wait (%p685_p0), %s483_s12, 256  }
 0x170   : > { %880 = vsyncadd (%p685_p0), %s483_s12, 4294967040  ;;  %p19_p5 = scmp.ge.s32.totalorder %s991_s14, 4   ;;  %s1098_s18 = smov %s887_s19 }
 0x171   : > { %s1099_s19 = smov %s891_s20  ;;  %s1100_s20 = smov %s1007_s23 }
 0x172   : > { %s1101_s21 = smov %s991_s14  ;;  %21 = sbr.rel (!%p19_p5) target bundleno = 6 (0x6), region = 93 }
 0x177   :  { %489 = vsyncpa [#allocation3], 1 }
 0x178   :  { %491 = vsyncpa [#allocation3 + $0x1], 1 }
 0x179   :  { %492 = vsyncpa [#allocation6], 1 }
 0x17a   :  { %493 = vsyncpa [#allocation4], 1 }
 0x17b   :  { %495 = vsyncpa [#allocation4 + $0x1], 1 }

// kernel: tpu_custom_call.1
= control target key start
LH: loop header
LB: loop body
LE: loop exit
PB: predicated region body
PF: predicated region fallthrough
CT: control target
= control target key end

     0   :  { %10 = vsyncpa [#allocation3], 0  ;;  %s1086_s0 = inlined_call_operand.hbm [shape: f32[32,128], index: 0, kind: input, shape index: {}]   ;;  %s1087_s1 = inlined_call_operand.hbm [shape: bf16[128,128], index: 1, kind: input, shape index: {}]   ;;  %s1088_s2 = inlined_call_operand.vmem [shape: f32[1,128], index: 2, kind: input, shape index: {}]   ;;  %s1089_s3 = inlined_call_operand.hbm [shape: bf16[128,128], index: 3, kind: input, shape index: {}]   ;;  %s1090_s4 = inlined_call_operand.vmem [shape: f32[1,128], index: 4, kind: input, shape index: {}]   ;;  %s1091_s5 = inlined_call_operand.hbm [shape: f32[32,128], index: 5, kind: output, shape index: {}]  }
   0x1   :  { %12 = vsyncpa [#allocation3 + $0x1], 0 }
   0x2   :  { %13 = vsyncpa [#allocation6], 0 }
   0x3   :  { %14 = vsyncpa [#allocation4], 0 }
   0x4   :  { %16 = vsyncpa [#allocation4 + $0x1], 0  ;;  %s935_s18 = smov 0   ;;  %s937_s19 = smov 0  }
   0x5   :  { %s939_s20 = smov 0   ;;  %s941_s21 = smov 0  }
   0x6 LB: > { %s956_s22 = sadd.s32 4294967295, %s895_s21   ;;  %s560_s23 = sadd.s32 4294967294, %s895_s21   ;;  %s895_s21 = sphi %s941_s21, %s1101_s21   ;;  %s891_s20 = sphi %s939_s20, %s1100_s20   ;;  %s887_s19 = sphi %s937_s19, %s1099_s19   ;;  %s883_s18 = sphi %s935_s18, %s1098_s18  }
   0x7   : > { %p42_p0 = scmp.ne.s32.totalorder %s887_s19, %s883_s18  ;;  %p43_p1 = scmp.eq.s32.totalorder %s956_s22, 0 }
   0x8   : > { %p150_p2 = scmp.eq.s32.totalorder %s956_s22, 1  ;;  %p156_p3 = scmp.eq.s32.totalorder %s560_s23, 1 }
   0x9   : > { %p965_p4 = por %p43_p1, %p42_p0  ;;  %p561_p5 = scmp.ge.s32.totalorder %s895_s21, 1 }
   0xa   : > { %p970_p6 = por %p156_p3, %p42_p0  ;;  %p163_p7 = scmp.lt.s32.totalorder %s895_s21, 3 }
   0xb   : > { %s174_s28 = sshll.u32 %s1087_s1, 4  ;;  %s897_s30 = smov [#allocation5]   ;;  %s175_s28 = int_to_ptr.hbm [resolvable:$true] %s174_s28 }
   0xc   : > { %p978_p8 = pnand %p561_p5, %p163_p7  ;;  %s176_s6 = sshll.u32 %s897_s30, 4  ;;  %s177_s6 = int_to_ptr.vmem [resolvable:$true] %s176_s6 }
   0xd   : > { %s191_s9 = sshll.u32 %s1089_s3, 4  ;;  %s898_s10 = smov 64   ;;  %s192_s9 = int_to_ptr.hbm [resolvable:$true] %s191_s9 }
   0xe   : > { %p672_p9 = pneg %p978_p8  ;;  %s899_s11 = smov 4  }
   0xf   : > { %s900_s12 = smov [#allocation7]   ;;  %s991_s14 = sadd.s32 1, %s895_s21  }
  0x10   : > { %p673_p10 = pnand %p672_p9, %p43_p1  ;;  %s193_s13 = sshll.u32 %s900_s12, 4  ;;  %s194_s13 = int_to_ptr.vmem [resolvable:$true] %s193_s13 }
  0x11   : > { %s29_s15 = sadd.s32 1, %s891_s20  ;;  %s26_s16 = ssub.s32 %s895_s21, %s991_s14 }
  0x12   : > { %675 = dma.hbm_to_vmem [thread:$0]  (!%p673_p10), %s175_s28, 1024, %s177_s6, [#allocation6], %s898_s10, %s898_s10, %s899_s11  }
  0x13   : > { %678 = dma.hbm_to_vmem [thread:$0]  (!%p673_p10), %s192_s9, 1024, %s194_s13, [#allocation6], %s898_s10, %s898_s10, %s899_s11  }
  0x14   : > { %p36_p12 = scmp.ne.s32.totalorder %s891_s20, %s887_s19  ;;  %p27_p13 = scmp.eq.s32.totalorder %s26_s16, 0 }
  0x15   : > { %p37_p0 = scmp.eq.s32.totalorder %s895_s21, 0  ;;  %p689_p5 = scmp.lt.s32.totalorder %s895_s21, 2 }
  0x16   : > { %p1001_p3 = por %p150_p2, %p36_p12  ;;  %s210_s26 = sand.u32 1, %s891_s20  }
  0x17   : > { %s1007_s23 = scalar_select %p27_p13, %s891_s20, %s29_s15  }
  0x18   : > { %p38_p7 = por %p37_p0, %p36_p12  ;;  %s565_s27 = sshll.u32 %s210_s26, 4 }
  0x19   : > { %s642_s28 = sshll.u32 %s895_s21, 4  ;;  %s214_s8 = scalar_lea.vmem [#allocation2], %s565_s27 }
  0x1a   : > { %s219_s7 = scalar_lea.hbm %s1086_s0, %s642_s28  ;;  %s222_s9 = sshll.u32 %s214_s8, 4  ;;  %s223_s9 = int_to_ptr.vmem [resolvable:$true] %s222_s9 }
  0x1b   : > { %s220_s10 = sshll.u32 %s219_s7, 4  ;;  %p1014_p2 = pnand %p689_p5, %p38_p7  ;;  %s221_s10 = int_to_ptr.hbm [resolvable:$true] %s220_s10 }
  0x1c   : > { %s211_s12 = scalar_lea.sflag [#allocation3], %s210_s26  ;;  %s795_s13 = sshra.s32 %s221_s10, 4  ;;  %s796_s13 = int_to_ptr.hbm [resolvable:$true] %s795_s13 }
  0x1d   : > { %s797_s15 = scalar_lea.hbm %s796_s13, 16  ;;  %p799_p10 = pneg %p1014_p2 }
  0x1e   : > { %p798_p9 = scmp.ne.s32.totalorder %s796_s13, %s797_s15  ;;  %s802_s28 = scalar_lea.hbm %s1086_s0, 32 }
  0x1f   : > { %p803_p0 = scmp.lt.s32.totalorder %s796_s13, %s1086_s0  ;;  %p804_p5 = scmp.lt.s32.totalorder %s802_s28, %s797_s15 }
  0x20   : > { %p800_p12 = pnand %p799_p10, %p798_p9 }
  0x21   : > { %p805_p7 = por %p804_p5, %p803_p0 }
  0x22   : > { %p801_p13 = pneg %p800_p12 }
  0x24   : > { %p806_p11 = pnand %p805_p7, %p801_p13 }
  0x26   : > { %809 = shalt.err (!%p806_p11)
}
  0x27   : > { %s901_s26 = smov 128   ;;  %s902_s7 = smov 8  }
  0x28   : > { %682 = dma.hbm_to_vmem [thread:$0]  (!%p1014_p2), %s221_s10, 256, %s223_s9, %s211_s12, %s901_s26, %s901_s26, %s902_s7  }
  0x29   : > { %234 = sbr.rel (%p978_p8) target bundleno = 361 (0x169), region = 40  ;;  %s1031_s8 = sand.u32 (!%p978_p8), 1, %s887_s19  }
  0x2a   : > { %s569_s13 = sshll.u32 (!%p978_p8), %s1031_s8, 4  ;;  %s237_s15 = scalar_lea.sflag (!%p978_p8), [#allocation3], %s1031_s8 }
  0x2b   : > { %s240_s16 = scalar_lea.vmem (!%p978_p8), [#allocation2], %s569_s13 }
  0x2e   : > { %870 = dma.done.wait (%p965_p4), %s237_s15, 256  }
  0x2f   : > { %872 = vsyncadd (%p965_p4), %s237_s15, 4294967040 }
  0x30   : > { %874 = dma.done.wait (%p43_p1), [#allocation6], 2048  }
  0x31   : > { %876 = vsyncadd (%p43_p1), [#allocation6], 4294965248  ;;  %v650_v0 = vld [vmem:[#allocation5 + $0x38] sm:$0xff]  ;;  %v649_v1 = vld [vmem:[#allocation5 + $0x30] sm:$0xff]  ;;  %s659_s11 = sshll.u32 %s956_s22, 4  ;;  %s277_s30 = scalar_lea.vmem [#allocation8], %s569_s13 }
  0x32   : > { %351 = vmatpush.bf16.msra.mxu0 %v650_v0  ;;  %v658_v2 = vld [vmem:[#allocation7 + $0x38] sm:$0xff]  ;;  %v657_v3 = vld [vmem:[#allocation7 + $0x30] sm:$0xff]  ;;  %v648_v4 = vld [vmem:[#allocation5 + $0x28] sm:$0xff]  ;;  %s464_s28 = scalar_lea.hbm %s1091_s5, %s659_s11  ;;  %s465_s6 = sshll.u32 %s277_s30, 4  ;;  %s466_s6 = int_to_ptr.vmem [resolvable:$true] %s465_s6 }
  0x33   : > { %436 = vmatpush.bf16.msra.mxu1 %v658_v2  ;;  %v656_v5 = vld [vmem:[#allocation7 + $0x28] sm:$0xff]  ;;  %v647_v6 = vld [vmem:[#allocation5 + $0x20] sm:$0xff]  ;;  %v646_v8 = vld [vmem:[#allocation5 + $0x18] sm:$0xff]  ;;  %s467_s26 = sshll.u32 %s464_s28, 4  ;;  %s453_s7 = scalar_lea.sflag [#allocation4], %s1031_s8  ;;  %s468_s26 = int_to_ptr.hbm [resolvable:$true] %s467_s26 }
  0x34   : > { %v655_v7 = vld [vmem:[#allocation7 + $0x20] sm:$0xff]  ;;  %v645_v9 = vld [vmem:[#allocation5 + $0x10] sm:$0xff]  ;;  %v644_v10 = vld [vmem:[#allocation5 + $0x8] sm:$0xff]  ;;  %s839_s15 = sshra.s32 %s468_s26, 4  ;;  %s845_s13 = scalar_lea.hbm %s1091_s5, 32  ;;  %s840_s15 = int_to_ptr.hbm [resolvable:$true] %s839_s15 }
  0x35   : > { %v643_v11 = vld [vmem:[#allocation5] sm:$0xff]  ;;  %v281_v13 = vld [vmem:[%s240_s16 + $0x8] sm:$0xff]  ;;  %v653_v16 = vld [vmem:[#allocation7 + $0x10] sm:$0xff]  ;;  %s841_s22 = scalar_lea.hbm %s840_s15, 16  ;;  %p846_p11 = scmp.lt.s32.totalorder %s840_s15, %s1091_s5 }
  0x36   : > { %352 = vmatpush.bf16.msra.mxu0 %v649_v1  ;;  %v280_v12 = vld [vmem:[%s240_s16] sm:$0xff]  ;;  %v654_v15 = vld [vmem:[#allocation7 + $0x18] sm:$0xff]  ;;  %v652_v17 = vld [vmem:[#allocation7 + $0x8] sm:$0xff]  ;;  %p842_p1 = scmp.ne.s32.totalorder %s840_s15, %s841_s22  ;;  %p847_p2 = scmp.lt.s32.totalorder %s845_s13, %s841_s22 }
  0x37   : > { %437 = vmatpush.bf16.msra.mxu1 %v657_v3  ;;  %v282_v14 = vpack.c.bf16 %v281_v13, %v280_v12  ;;  %v651_v18 = vld [vmem:[#allocation7] sm:$0xff] }
  0x38   : > { %v733_v20 = vld [vmem:[%s1088_s2] ss:$0 sm:$0xff]  ;;  %p843_p4 = pnand %p842_p1, %p1001_p3  ;;  %p848_p9 = por %p847_p2, %p846_p11 }
  0x39   : > { %v734_v27 = vld [vmem:[%s1090_s4] ss:$0 sm:$0xff] }
  0x3a   : > { %353 = vmatpush.bf16.msra.mxu0 %v648_v4  ;;  %p844_p8 = pneg %p843_p4 }
  0x3b   : > { %438 = vmatpush.bf16.msra.mxu1 %v656_v5 }
  0x3c   : > { %p849_p10 = pnand %p848_p9, %p844_p8 }
  0x3e   : > { %354 = vmatpush.bf16.msra.mxu0 %v647_v6 }
  0x3f   : > { %439 = vmatpush.bf16.msra.mxu1 %v655_v7 }
  0x42   : > { %355 = vmatpush.bf16.msra.mxu0 %v646_v8 }
  0x43   : > { %440 = vmatpush.bf16.msra.mxu1 %v654_v15 }
  0x46   : > { %356 = vmatpush.bf16.msra.mxu0 %v645_v9 }
  0x47   : > { %441 = vmatpush.bf16.msra.mxu1 %v653_v16 }
  0x4a   : > { %357 = vmatpush.bf16.msra.mxu0 %v644_v10 }
  0x4b   : > { %442 = vmatpush.bf16.msra.mxu1 %v652_v17 }
  0x4e   : > { %358 = vmatpush.bf16.msra.mxu0 %v643_v11 }
  0x4f   : > { %443 = vmatpush.bf16.msra.mxu1 %v651_v18 }
  0x51   : > { %359 = vmatmul.bf16.vlgmr.msra.gmra.mxu0 %v282_v14 }
  0xce   : > { %v360_v19 = vpop.f32.mrf.mxu0 }
  0xcf   : > { %v361_v21 = vadd.f32 %v733_v20, %v360_v19 }
  0xd1   : > { %v365_v24 = vmax.f32 %v361_v21, 0.0 }
  0xd6   : > { %v362_v22 = vpop.f32.mrf.mxu0 }
  0xd7   : > { %v363_v23 = vadd.f32 %v733_v20, %v362_v22 }
  0xd9   : > { %v366_v25 = vmax.f32 %v363_v23, 0.0 }
  0xdb   : > { %v367_v26 = vpack.c.bf16 %v366_v25, %v365_v24 }
  0xdd   : > { %444 = vmatmul.bf16.vlgmr.msra.gmra.mxu1 %v367_v26 }
 0x15a   : > { %v445_v28 = vpop.f32.mrf.mxu1 }
 0x15b   : > { %v446_v29 = vadd.f32 %v734_v27, %v445_v28 }
 0x15d   : > { %450 = vst [vmem:[%s277_s30] sm:$0xff] %v446_v29 }
 0x162   : > { %v447_v30 = vpop.f32.mrf.mxu1 }
 0x163   : > { %v448_v31 = vadd.f32 %v734_v27, %v447_v30 }
 0x165   : > { %451 = vst [vmem:[%s277_s30 + $0x8] sm:$0xff] %v448_v31 }
 0x166   : > { %852 = shalt.err (!%p849_p10)
}
 0x167   : > { %s903_s8 = smov 128   ;;  %s904_s10 = smov 8  }
 0x168   : > { %670 = dma.vmem_to_hbm [thread:$0]  (%p1001_p3), %s466_s6, 256, %s468_s26, %s453_s7, %s903_s8, %s903_s8, %s904_s10  }
 0x169 PF: > { %s482_s11 = sand.u32 1, %s883_s18   ;;  %p1097_p12 = scmp.ge.s32.totalorder %s895_s21, 2 }
 0x16a   : > { %s483_s12 = scalar_lea.sflag [#allocation4], %s482_s11 }
 0x16b   : > { %p684_p13 = pnand %p1097_p12, %p970_p6 }
 0x16d   : > { %p685_p0 = pneg %p684_p13 }
 0x16f   : > { %878 = dma.done.wait (%p685_p0), %s483_s12, 256  }
 0x170   : > { %880 = vsyncadd (%p685_p0), %s483_s12, 4294967040  ;;  %p19_p5 = scmp.ge.s32.totalorder %s991_s14, 4   ;;  %s1098_s18 = smov %s887_s19 }
 0x171   : > { %s1099_s19 = smov %s891_s20  ;;  %s1100_s20 = smov %s1007_s23 }
 0x172   : > { %s1101_s21 = smov %s991_s14  ;;  %21 = sbr.rel (!%p19_p5) target bundleno = 6 (0x6), region = 93 }
 0x177   :  { %489 = vsyncpa [#allocation3], 1 }
 0x178   :  { %491 = vsyncpa [#allocation3 + $0x1], 1 }
 0x179   :  { %492 = vsyncpa [#allocation6], 1 }
 0x17a   :  { %493 = vsyncpa [#allocation4], 1 }
 0x17b   :  { %495 = vsyncpa [#allocation4 + $0x1], 1 }

</bundles_post_ra>
